<compile_context>
chip_gen: v7x
topology: tpu7x:2x2x1
jax: 0.10.0
libtpu: 0.0.40
codegen_flags: <defaults>
</compile_context>

<pallas_src>
import jax
import jax.numpy as jnp
from jax.experimental import pallas as pl
from jax.experimental.pallas import tpu as pltpu


def _round_up(a, b):
    return ((a + b - 1) // b) * b


def _mlp_tail(h, wb_refs, out_ref):
    """Unrolled Linear->ReLU stack. h may be f32; it is cast to the weight dtype
    before each MXU matmul; accumulation/bias/ReLU stay in f32."""
    n_layers = len(wb_refs) // 2
    for i in range(n_layers):
        w = wb_refs[2 * i][...]          # (in, out)  compute dtype
        b = wb_refs[2 * i + 1][...]      # (1, out)   f32
        h = jnp.dot(h.astype(w.dtype), w, preferred_element_type=jnp.float32)
        h = jnp.maximum(h + b, 0.0)
    out_ref[...] = h.astype(out_ref.dtype)


def _make_kernel_fused(n_f_rest, n_g_rest, h_split):
    """First layers of both MLPs fused into one wide matmul, then split."""
    n_in = 3 + 2 * (n_f_rest + n_g_rest)

    def kernel(*refs):
        x = refs[0][...]                 # (block_m, d_in)   compute dtype
        w0 = refs[1][...]                # (d_in, Hf+Hg)     compute dtype
        b0 = refs[2][...]                # (1, Hf+Hg)        f32
        h = jnp.maximum(
            jnp.dot(x, w0, preferred_element_type=jnp.float32) + b0, 0.0)
        f_wb = refs[3:3 + 2 * n_f_rest]
        g_wb = refs[3 + 2 * n_f_rest:n_in]
        _mlp_tail(h[:, :h_split], f_wb, refs[n_in])
        _mlp_tail(h[:, h_split:], g_wb, refs[n_in + 1])

    return kernel


def _make_kernel_separate(n_f, n_g):
    """Fallback: run the two MLPs independently on the shared x tile."""
    n_in = 1 + 2 * (n_f + n_g)

    def kernel(*refs):
        x = refs[0][...]
        _mlp_tail(x, refs[1:1 + 2 * n_f], refs[n_in])
        _mlp_tail(x, refs[1 + 2 * n_f:n_in], refs[n_in + 1])

    return kernel


def _pad_last_layer_cols(params):
    """Zero-pad the last layer's output columns to a multiple of 128 (lane-dense)."""
    params = list(params)
    w, b = params[-1]
    d_out = w.shape[1]
    d_pad = _round_up(d_out, 128)
    if d_pad != d_out:
        w = jnp.pad(w, ((0, 0), (0, d_pad - d_out)))
        b = jnp.pad(b, ((0, 0), (0, d_pad - d_out)))
        params[-1] = (w, b)
    return params, d_pad


def neural_ode_forward(x, f_params, g_params, *, block_m=512,
                       compute_dtype=jnp.bfloat16):
    """NeuralODE.forward via a single fused Pallas kernel.

    x:                 (N, D) float32
    f_params/g_params: list of (w, b) with w (in, out), b (1, out), float32
    compute_dtype:     matmul operand dtype (bf16 default; jnp.float32 for a
                       high-precision path)
    returns:           (f, g) with shapes (N, dims_f[-1]) and (N, dims_g[-1]), f32
    """
    n, d_in = x.shape
    d_f = f_params[-1][0].shape[1]
    d_g = g_params[-1][0].shape[1]

    # ---- lane-dense output columns -----------------------------------------
    f_params_p, d_f_pad = _pad_last_layer_cols(f_params)
    g_params_p, d_g_pad = _pad_last_layer_cols(g_params)

    # ---- batch tile: no forced 256-row floor --------------------------------
    min_tile = 16 if compute_dtype == jnp.bfloat16 else 8
    block_m = min(int(block_m), _round_up(n, min_tile))
    block_m = _round_up(max(block_m, min_tile), min_tile)
    n_pad = _round_up(n, block_m)
    # v7x: give the "parallel" axis >= 2 grid steps so both TensorCores work.
    if n_pad // block_m == 1 and block_m >= 2 * min_tile:
        half = _round_up(block_m // 2, min_tile)
        if half < block_m:
            block_m = half
            n_pad = _round_up(n, block_m)
    grid_m = n_pad // block_m

    if n_pad != n:
        x = jnp.pad(x, ((0, n_pad - n), (0, 0)))
    x_c = x.astype(compute_dtype)

    # ---- fuse the shared-input first layers when the split is lane-aligned --
    h_split = f_params_p[0][0].shape[1]
    fuse_first = (h_split % 128 == 0)
    if fuse_first:
        f_w0, f_b0 = f_params_p[0]
        g_w0, g_b0 = g_params_p[0]
        layer_list = ([(jnp.concatenate([f_w0, g_w0], axis=1),
                        jnp.concatenate([f_b0, g_b0], axis=1))]
                      + f_params_p[1:] + g_params_p[1:])
        kernel = _make_kernel_fused(len(f_params_p) - 1, len(g_params_p) - 1,
                                    h_split)
    else:
        layer_list = f_params_p + g_params_p
        kernel = _make_kernel_separate(len(f_params_p), len(g_params_p))

    flat_params = []
    for w, b in layer_list:
        flat_params.append(w.astype(compute_dtype))
        flat_params.append(b.astype(jnp.float32))

    # ---- specs ---------------------------------------------------------------
    in_specs = [pl.BlockSpec((block_m, d_in), lambda i: (i, 0))]
    # Weights/biases: whole array, constant index map => VMEM-resident all grid.
    in_specs += [pl.BlockSpec(a.shape, lambda i: (0, 0)) for a in flat_params]

    out_specs = (
        pl.BlockSpec((block_m, d_f_pad), lambda i: (i, 0)),
        pl.BlockSpec((block_m, d_g_pad), lambda i: (i, 0)),
    )
    out_shape = (
        jax.ShapeDtypeStruct((n_pad, d_f_pad), jnp.float32),
        jax.ShapeDtypeStruct((n_pad, d_g_pad), jnp.float32),
    )

    # ---- VMEM / cost bookkeeping ---------------------------------------------
    itemsize_c = jnp.dtype(compute_dtype).itemsize
    weight_bytes = sum(int(a.size) * a.dtype.itemsize for a in flat_params)
    max_width = max([d_in] + [int(w.shape[1]) for w, _ in layer_list])
    act_bytes = block_m * (d_in * itemsize_c + 4 * (d_f_pad + d_g_pad)
                           + 8 * max_width)
    vmem_est = 2 * weight_bytes + 2 * act_bytes
    # Only override the scoped-VMEM default when the footprint actually needs it
    # (production hidden sizes); small configs keep the compiler default.
    vmem_limit = (int(min(1.5 * vmem_est, 96 * 1024 * 1024))
                  if vmem_est > (16 << 20) else None)

    total_mac = sum(int(w.shape[0]) * int(w.shape[1])
                    for w, _ in (list(f_params) + list(g_params)))
    cost = pl.CostEstimate(
        flops=2 * n_pad * total_mac,
        transcendentals=0,
        bytes_accessed=int(n_pad * d_in * itemsize_c) + weight_bytes
                       + int(n_pad * (d_f_pad + d_g_pad) * 4),
    )

    f_out, g_out = pl.pallas_call(
        kernel,
        out_shape=out_shape,
        grid_spec=pltpu.PrefetchScalarGridSpec(
            num_scalar_prefetch=0,
            grid=(grid_m,),
            in_specs=in_specs,
            out_specs=out_specs,
        ),
        compiler_params=pltpu.CompilerParams(
            dimension_semantics=("parallel",),
            vmem_limit_bytes=vmem_limit),
        cost_estimate=cost,
    )(x_c, *flat_params)

    return f_out[:n, :d_f], g_out[:n, :d_g]


def init_mlp_params(key, dims):
    """Deterministic synthetic init (uniform, torch-Linear-like scaling)."""
    params = []
    keys = jax.random.split(key, 2 * (len(dims) - 1))
    for i in range(len(dims) - 1):
        fan_in, fan_out = dims[i], dims[i + 1]
        bound = 1.0 / jnp.sqrt(jnp.float32(fan_in))
        w = jax.random.uniform(keys[2 * i], (fan_in, fan_out), jnp.float32,
                               -bound, bound)
        b = jax.random.uniform(keys[2 * i + 1], (1, fan_out), jnp.float32,
                               -bound, bound)
        params.append((w, b))
    return params


def neural_ode_forward_ref(x, f_params, g_params):
    """Pure-JAX f32 reference for correctness check."""
    def mlp(h, params):
        for w, b in params:
            h = jnp.maximum(h @ w + b, 0.0)
        return h
    return mlp(x, f_params), mlp(x, g_params)


if __name__ == "__main__":
    batch = 8
    latent_dim = 32
    h_dim = 128       # module default hidden is larger; small synthetic size here
    u_dim = 4
    dims_f = [latent_dim, h_dim, h_dim, latent_dim]
    dims_g = [latent_dim, h_dim, h_dim, latent_dim * u_dim]

    key = jax.random.PRNGKey(0)
    k_x, k_f, k_g, k_x2 = jax.random.split(key, 4)
    x = jax.random.normal(k_x, (batch, latent_dim), jnp.float32)
    f_params = init_mlp_params(k_f, dims_f)
    g_params = init_mlp_params(k_g, dims_g)

    f_ref, g_ref = neural_ode_forward_ref(x, f_params, g_params)

    # Default bf16-MXU path (small batch => 16-row tile, fused first layers,
    # lane-dense padded f output).
    f_out, g_out = neural_ode_forward(x, f_params, g_params)
    f_out, g_out = jax.block_until_ready((f_out, g_out))
    assert f_out.shape == (batch, latent_dim)
    assert g_out.shape == (batch, latent_dim * u_dim)
    assert jnp.allclose(f_out, f_ref, atol=5e-2, rtol=5e-2), "f mismatch (bf16)"
    assert jnp.allclose(g_out, g_ref, atol=5e-2, rtol=5e-2), "g mismatch (bf16)"

    # f32 path with a batch that exercises padding and >= 2 grid steps.
    batch2 = 300
    x2 = jax.random.normal(k_x2, (batch2, latent_dim), jnp.float32)
    f_ref2, g_ref2 = neural_ode_forward_ref(x2, f_params, g_params)
    f2, g2 = neural_ode_forward(x2, f_params, g_params,
                                compute_dtype=jnp.float32)
    f2, g2 = jax.block_until_ready((f2, g2))
    assert f2.shape == (batch2, latent_dim)
    assert g2.shape == (batch2, latent_dim * u_dim)
    assert jnp.allclose(f2, f_ref2, atol=2e-2, rtol=2e-2), "f mismatch (f32)"
    assert jnp.allclose(g2, g_ref2, atol=2e-2, rtol=2e-2), "g mismatch (f32)"

    print("KERNEL_OK")
</pallas_src>

<mosaic_0001>
module attributes {stable_mosaic.version = 11 : i64} {
  func.func @kernel(%arg0: i32, %arg1: memref<16x32xbf16, #tpu.memory_space<vmem>>, %arg2: memref<32x256xbf16, #tpu.memory_space<vmem>>, %arg3: memref<1x256xf32, #tpu.memory_space<vmem>>, %arg4: memref<128x128xbf16, #tpu.memory_space<vmem>>, %arg5: memref<1x128xf32, #tpu.memory_space<vmem>>, %arg6: memref<128x128xbf16, #tpu.memory_space<vmem>>, %arg7: memref<1x128xf32, #tpu.memory_space<vmem>>, %arg8: memref<128x128xbf16, #tpu.memory_space<vmem>>, %arg9: memref<1x128xf32, #tpu.memory_space<vmem>>, %arg10: memref<128x128xbf16, #tpu.memory_space<vmem>>, %arg11: memref<1x128xf32, #tpu.memory_space<vmem>>, %arg12: memref<16x128xf32, #tpu.memory_space<vmem>>, %arg13: memref<16x128xf32, #tpu.memory_space<vmem>>) attributes {dimension_semantics = [#tpu.dimension_semantics<parallel>], iteration_bounds = array<i64: 1>, scalar_prefetch = 0 : i64, scratch_operands = 0 : i64, tpu.core_type = #tpu.core_type<tc>, window_params = [{transform_indices = @transform_0, window_bounds = array<i64: 16, 32>}, {pipeline_mode = #tpu.pipeline_mode<synchronous>, transform_indices = @transform_1, window_bounds = array<i64: 32, 256>}, {pipeline_mode = #tpu.pipeline_mode<synchronous>, transform_indices = @transform_2, window_bounds = array<i64: 1, 256>}, {pipeline_mode = #tpu.pipeline_mode<synchronous>, transform_indices = @transform_3, window_bounds = array<i64: 128, 128>}, {pipeline_mode = #tpu.pipeline_mode<synchronous>, transform_indices = @transform_4, window_bounds = array<i64: 1, 128>}, {pipeline_mode = #tpu.pipeline_mode<synchronous>, transform_indices = @transform_5, window_bounds = array<i64: 128, 128>}, {pipeline_mode = #tpu.pipeline_mode<synchronous>, transform_indices = @transform_6, window_bounds = array<i64: 1, 128>}, {pipeline_mode = #tpu.pipeline_mode<synchronous>, transform_indices = @transform_7, window_bounds = array<i64: 128, 128>}, {pipeline_mode = #tpu.pipeline_mode<synchronous>, transform_indices = @transform_8, window_bounds = array<i64: 1, 128>}, {pipeline_mode = #tpu.pipeline_mode<synchronous>, transform_indices = @transform_9, window_bounds = array<i64: 128, 128>}, {pipeline_mode = #tpu.pipeline_mode<synchronous>, transform_indices = @transform_10, window_bounds = array<i64: 1, 128>}, {transform_indices = @transform_11, window_bounds = array<i64: 16, 128>}, {transform_indices = @transform_12, window_bounds = array<i64: 16, 128>}]} {
    %c0 = arith.constant 0 : index
    %c0_0 = arith.constant 0 : index
    %0 = vector.load %arg1[%c0, %c0_0] : memref<16x32xbf16, #tpu.memory_space<vmem>>, vector<16x32xbf16>
    %c0_1 = arith.constant 0 : index
    %c0_2 = arith.constant 0 : index
    %1 = vector.load %arg2[%c0_1, %c0_2] : memref<32x256xbf16, #tpu.memory_space<vmem>>, vector<32x256xbf16>
    %c0_3 = arith.constant 0 : index
    %c0_4 = arith.constant 0 : index
    %2 = vector.load %arg3[%c0_3, %c0_4] : memref<1x256xf32, #tpu.memory_space<vmem>>, vector<1x256xf32>
    %cst = arith.constant dense<0.000000e+00> : vector<16x256xf32>
    %3 = tpu.matmul %0, %1, %cst {dimension_numbers = #tpu.dot_dimension_numbers<[1], [0], [0], [1], [0, 0, 1, 1], [], []>} : vector<16x32xbf16>, vector<32x256xbf16>, vector<16x256xf32> -> vector<16x256xf32>
    %4 = vector.broadcast %2 : vector<1x256xf32> to vector<16x256xf32>
    %5 = arith.addf %3, %4 : vector<16x256xf32>
    %cst_5 = arith.constant 0.000000e+00 : f32
    %6 = vector.broadcast %cst_5 : f32 to vector<16x256xf32>
    %7 = arith.maximumf %5, %6 : vector<16x256xf32>
    %8 = vector.extract_strided_slice %7 {offsets = [0, 0], sizes = [16, 128], strides = [1, 1]} : vector<16x256xf32> to vector<16x128xf32>
    %c0_6 = arith.constant 0 : index
    %c0_7 = arith.constant 0 : index
    %9 = vector.load %arg4[%c0_6, %c0_7] : memref<128x128xbf16, #tpu.memory_space<vmem>>, vector<128x128xbf16>
    %c0_8 = arith.constant 0 : index
    %c0_9 = arith.constant 0 : index
    %10 = vector.load %arg5[%c0_8, %c0_9] : memref<1x128xf32, #tpu.memory_space<vmem>>, vector<1x128xf32>
    %11 = arith.truncf %8 : vector<16x128xf32> to vector<16x128xbf16>
    %cst_10 = arith.constant dense<0.000000e+00> : vector<16x128xf32>
    %12 = tpu.matmul %11, %9, %cst_10 {dimension_numbers = #tpu.dot_dimension_numbers<[1], [0], [0], [1], [0, 0, 1, 1], [], []>} : vector<16x128xbf16>, vector<128x128xbf16>, vector<16x128xf32> -> vector<16x128xf32>
    %13 = vector.broadcast %10 : vector<1x128xf32> to vector<16x128xf32>
    %14 = arith.addf %12, %13 : vector<16x128xf32>
    %cst_11 = arith.constant 0.000000e+00 : f32
    %15 = vector.broadcast %cst_11 : f32 to vector<16x128xf32>
    %16 = arith.maximumf %14, %15 : vector<16x128xf32>
    %c0_12 = arith.constant 0 : index
    %c0_13 = arith.constant 0 : index
    %17 = vector.load %arg6[%c0_12, %c0_13] : memref<128x128xbf16, #tpu.memory_space<vmem>>, vector<128x128xbf16>
    %c0_14 = arith.constant 0 : index
    %c0_15 = arith.constant 0 : index
    %18 = vector.load %arg7[%c0_14, %c0_15] : memref<1x128xf32, #tpu.memory_space<vmem>>, vector<1x128xf32>
    %19 = arith.truncf %16 : vector<16x128xf32> to vector<16x128xbf16>
    %cst_16 = arith.constant dense<0.000000e+00> : vector<16x128xf32>
    %20 = tpu.matmul %19, %17, %cst_16 {dimension_numbers = #tpu.dot_dimension_numbers<[1], [0], [0], [1], [0, 0, 1, 1], [], []>} : vector<16x128xbf16>, vector<128x128xbf16>, vector<16x128xf32> -> vector<16x128xf32>
    %21 = vector.broadcast %18 : vector<1x128xf32> to vector<16x128xf32>
    %22 = arith.addf %20, %21 : vector<16x128xf32>
    %cst_17 = arith.constant 0.000000e+00 : f32
    %23 = vector.broadcast %cst_17 : f32 to vector<16x128xf32>
    %24 = arith.maximumf %22, %23 : vector<16x128xf32>
    %c0_18 = arith.constant 0 : index
    %c0_19 = arith.constant 0 : index
    %25 = vector.load %arg12[%c0_18, %c0_19] : memref<16x128xf32, #tpu.memory_space<vmem>>, vector<16x128xf32>
    tpu.vector_store %arg12[%c0_18, %c0_19], %24 {strides = array<i32>} : memref<16x128xf32, #tpu.memory_space<vmem>>, vector<16x128xf32>,
    %26 = vector.extract_strided_slice %7 {offsets = [0, 128], sizes = [16, 128], strides = [1, 1]} : vector<16x256xf32> to vector<16x128xf32>
    %c0_20 = arith.constant 0 : index
    %c0_21 = arith.constant 0 : index
    %27 = vector.load %arg8[%c0_20, %c0_21] : memref<128x128xbf16, #tpu.memory_space<vmem>>, vector<128x128xbf16>
    %c0_22 = arith.constant 0 : index
    %c0_23 = arith.constant 0 : index
    %28 = vector.load %arg9[%c0_22, %c0_23] : memref<1x128xf32, #tpu.memory_space<vmem>>, vector<1x128xf32>
    %29 = arith.truncf %26 : vector<16x128xf32> to vector<16x128xbf16>
    %cst_24 = arith.constant dense<0.000000e+00> : vector<16x128xf32>
    %30 = tpu.matmul %29, %27, %cst_24 {dimension_numbers = #tpu.dot_dimension_numbers<[1], [0], [0], [1], [0, 0, 1, 1], [], []>} : vector<16x128xbf16>, vector<128x128xbf16>, vector<16x128xf32> -> vector<16x128xf32>
    %31 = vector.broadcast %28 : vector<1x128xf32> to vector<16x128xf32>
    %32 = arith.addf %30, %31 : vector<16x128xf32>
    %cst_25 = arith.constant 0.000000e+00 : f32
    %33 = vector.broadcast %cst_25 : f32 to vector<16x128xf32>
    %34 = arith.maximumf %32, %33 : vector<16x128xf32>
    %c0_26 = arith.constant 0 : index
    %c0_27 = arith.constant 0 : index
    %35 = vector.load %arg10[%c0_26, %c0_27] : memref<128x128xbf16, #tpu.memory_space<vmem>>, vector<128x128xbf16>
    %c0_28 = arith.constant 0 : index
    %c0_29 = arith.constant 0 : index
    %36 = vector.load %arg11[%c0_28, %c0_29] : memref<1x128xf32, #tpu.memory_space<vmem>>, vector<1x128xf32>
    %37 = arith.truncf %34 : vector<16x128xf32> to vector<16x128xbf16>
    %cst_30 = arith.constant dense<0.000000e+00> : vector<16x128xf32>
    %38 = tpu.matmul %37, %35, %cst_30 {dimension_numbers = #tpu.dot_dimension_numbers<[1], [0], [0], [1], [0, 0, 1, 1], [], []>} : vector<16x128xbf16>, vector<128x128xbf16>, vector<16x128xf32> -> vector<16x128xf32>
    %39 = vector.broadcast %36 : vector<1x128xf32> to vector<16x128xf32>
    %40 = arith.addf %38, %39 : vector<16x128xf32>
    %cst_31 = arith.constant 0.000000e+00 : f32
    %41 = vector.broadcast %cst_31 : f32 to vector<16x128xf32>
    %42 = arith.maximumf %40, %41 : vector<16x128xf32>
    %c0_32 = arith.constant 0 : index
    %c0_33 = arith.constant 0 : index
    %43 = vector.load %arg13[%c0_32, %c0_33] : memref<16x128xf32, #tpu.memory_space<vmem>>, vector<16x128xf32>
    tpu.vector_store %arg13[%c0_32, %c0_33], %42 {strides = array<i32>} : memref<16x128xf32, #tpu.memory_space<vmem>>, vector<16x128xf32>,
    return
  }
  func.func @transform_0(%arg0: i32) -> (i32, i32) {
    %c0_i32 = arith.constant 0 : i32
    %c0_i32_0 = arith.constant 0 : i32
    return %arg0, %c0_i32 : i32, i32
  }
  func.func @transform_1(%arg0: i32) -> (i32, i32) {
    %c0_i32 = arith.constant 0 : i32
    %c0_i32_0 = arith.constant 0 : i32
    %c0_i32_1 = arith.constant 0 : i32
    return %c0_i32, %c0_i32_0 : i32, i32
  }
  func.func @transform_2(%arg0: i32) -> (i32, i32) {
    %c0_i32 = arith.constant 0 : i32
    %c0_i32_0 = arith.constant 0 : i32
    %c0_i32_1 = arith.constant 0 : i32
    return %c0_i32, %c0_i32_0 : i32, i32
  }
  func.func @transform_3(%arg0: i32) -> (i32, i32) {
    %c0_i32 = arith.constant 0 : i32
    %c0_i32_0 = arith.constant 0 : i32
    %c0_i32_1 = arith.constant 0 : i32
    return %c0_i32, %c0_i32_0 : i32, i32
  }
  func.func @transform_4(%arg0: i32) -> (i32, i32) {
    %c0_i32 = arith.constant 0 : i32
    %c0_i32_0 = arith.constant 0 : i32
    %c0_i32_1 = arith.constant 0 : i32
    return %c0_i32, %c0_i32_0 : i32, i32
  }
  func.func @transform_5(%arg0: i32) -> (i32, i32) {
    %c0_i32 = arith.constant 0 : i32
    %c0_i32_0 = arith.constant 0 : i32
    %c0_i32_1 = arith.constant 0 : i32
    return %c0_i32, %c0_i32_0 : i32, i32
  }
  func.func @transform_6(%arg0: i32) -> (i32, i32) {
    %c0_i32 = arith.constant 0 : i32
    %c0_i32_0 = arith.constant 0 : i32
    %c0_i32_1 = arith.constant 0 : i32
    return %c0_i32, %c0_i32_0 : i32, i32
  }
  func.func @transform_7(%arg0: i32) -> (i32, i32) {
    %c0_i32 = arith.constant 0 : i32
    %c0_i32_0 = arith.constant 0 : i32
    %c0_i32_1 = arith.constant 0 : i32
    return %c0_i32, %c0_i32_0 : i32, i32
  }
  func.func @transform_8(%arg0: i32) -> (i32, i32) {
    %c0_i32 = arith.constant 0 : i32
    %c0_i32_0 = arith.constant 0 : i32
    %c0_i32_1 = arith.constant 0 : i32
    return %c0_i32, %c0_i32_0 : i32, i32
  }
  func.func @transform_9(%arg0: i32) -> (i32, i32) {
    %c0_i32 = arith.constant 0 : i32
    %c0_i32_0 = arith.constant 0 : i32
    %c0_i32_1 = arith.constant 0 : i32
    return %c0_i32, %c0_i32_0 : i32, i32
  }
  func.func @transform_10(%arg0: i32) -> (i32, i32) {
    %c0_i32 = arith.constant 0 : i32
    %c0_i32_0 = arith.constant 0 : i32
    %c0_i32_1 = arith.constant 0 : i32
    return %c0_i32, %c0_i32_0 : i32, i32
  }
  func.func @transform_11(%arg0: i32) -> (i32, i32) {
    %c0_i32 = arith.constant 0 : i32
    %c0_i32_0 = arith.constant 0 : i32
    return %arg0, %c0_i32 : i32, i32
  }
  func.func @transform_12(%arg0: i32) -> (i32, i32) {
    %c0_i32 = arith.constant 0 : i32
    %c0_i32_0 = arith.constant 0 : i32
    return %arg0, %c0_i32 : i32, i32
  }
}

</mosaic_0001>

<bundles_post_ra>
// kernel: tpu_custom_call.1
= control target key start
LH: loop header
LB: loop body
LE: loop exit
PB: predicated region body
PF: predicated region fallthrough
CT: control target
= control target key end

     0   :  { %18 = vsyncpa [#allocation3], 0  ;;  %s1374_s0 = inlined_call_operand.hbm [shape: bf16[16,32], index: 0, kind: input, shape index: {}]   ;;  %s1375_s1 = inlined_call_operand.hbm [shape: bf16[32,256], index: 1, kind: input, shape index: {}]   ;;  %s1376_s2 = inlined_call_operand.vmem [shape: f32[1,256], index: 2, kind: input, shape index: {}]   ;;  %s1377_s3 = inlined_call_operand.hbm [shape: bf16[128,128], index: 3, kind: input, shape index: {}]   ;;  %s1378_s4 = inlined_call_operand.vmem [shape: f32[1,128], index: 4, kind: input, shape index: {}]   ;;  %s1379_s5 = inlined_call_operand.hbm [shape: bf16[128,128], index: 5, kind: input, shape index: {}]   ;;  %s1380_s6 = inlined_call_operand.vmem [shape: f32[1,128], index: 6, kind: input, shape index: {}]   ;;  %s1381_s7 = inlined_call_operand.hbm [shape: bf16[128,128], index: 7, kind: input, shape index: {}]   ;;  %s1382_s8 = inlined_call_operand.vmem [shape: f32[1,128], index: 8, kind: input, shape index: {}]   ;;  %s1383_s9 = inlined_call_operand.hbm [shape: bf16[128,128], index: 9, kind: input, shape index: {}]   ;;  %s1384_s10 = inlined_call_operand.vmem [shape: f32[1,128], index: 10, kind: input, shape index: {}]   ;;  %s1385_s11 = inlined_call_operand.hbm [shape: f32[16,128], index: 11, kind: output, shape index: {0}]   ;;  %s1386_s12 = inlined_call_operand.hbm [shape: f32[16,128], index: 12, kind: output, shape index: {1}]  }
   0x1   :  { %19 = vsyncpa [#allocation6], 0 }
   0x2   :  { %20 = vsyncpa [#allocation9], 0 }
   0x3   :  { %21 = vsyncpa [#allocation12], 0 }
   0x4   :  { %22 = vsyncpa [#allocation4], 0 }
   0x5   :  { %23 = vsyncpa [#allocation15], 0  ;;  %s1119_s21 = smov [#allocation5]   ;;  %s931_s25 = scalar_lea.hbm %s1375_s1, 512 }
   0x6   :  { %s41_s22 = sshll.u32 %s1119_s21, 4  ;;  %p932_p0 = scmp.ne.s32.totalorder %s1375_s1, %s931_s25  ;;  %s42_s22 = int_to_ptr.vmem [resolvable:$true] %s41_s22 }
   0x7   :  { %p935_p1 = scmp.lt.u32.totalorder %s931_s25, %s1375_s1 }
   0x9   :  { %p937_p2 = pnand %p935_p1, %p932_p0 }
   0xb   :  { %940 = shalt.err (!%p937_p2)
}
   0xc   :  { %s941_s30 = scalar_lea.vmem %s42_s22, 512  ;;  %p946_p4 = scmp.lt.s32.totalorder %s42_s22, %s42_s22 }
   0xd   :  { %p942_p3 = scmp.ne.s32.totalorder %s42_s22, %s941_s30  ;;  %p947_p5 = scmp.lt.s32.totalorder %s941_s30, %s941_s30 }
   0xf   :  { %p948_p6 = por %p947_p5, %p946_p4 }
  0x11   :  { %p949_p7 = pnand %p948_p6, %p942_p3 }
  0x13   :  { %952 = shalt.err (!%p949_p7)
}
  0x14   :  { %s1120_s13 = smov 128   ;;  %s1121_s14 = smov 8  }
  0x15   :  { %47 = dma.hbm_to_vmem [thread:$0]  %s1375_s1, 512, %s42_s22, [#allocation6], %s1120_s13, %s1120_s13, %s1121_s14  }
  0x16   :  { %s1122_s17 = smov [#allocation8]   ;;  %s1123_s19 = smov [#allocation2]  }
  0x17   :  { %s69_s18 = sshll.u32 %s1122_s17, 4  ;;  %s29_s20 = sshll.u32 %s1123_s19, 4  ;;  %s70_s18 = int_to_ptr.vmem [resolvable:$true] %s69_s18  ;;  %s30_s20 = int_to_ptr.vmem [resolvable:$true] %s29_s20 }
  0x18   :  { %s953_s24 = scalar_lea.hbm %s1379_s5, 1024 }
  0x19   :  { %p954_p8 = scmp.ne.s32.totalorder %s1379_s5, %s953_s24  ;;  %p957_p9 = scmp.lt.u32.totalorder %s953_s24, %s1379_s5 }
  0x1b   :  { %p959_p10 = pnand %p957_p9, %p954_p8 }
  0x1d   :  { %962 = shalt.err (!%p959_p10)
}
  0x1e   :  { %s963_s1 = scalar_lea.vmem %s70_s18, 1024  ;;  %p968_p12 = scmp.lt.s32.totalorder %s70_s18, %s70_s18 }
  0x1f   :  { %p964_p11 = scmp.ne.s32.totalorder %s70_s18, %s963_s1  ;;  %p969_p13 = scmp.lt.s32.totalorder %s963_s1, %s963_s1 }
  0x21   :  { %p970_p0 = por %p969_p13, %p968_p12 }
  0x23   :  { %p971_p1 = pnand %p970_p0, %p964_p11 }
  0x25   :  { %974 = shalt.err (!%p971_p1)
}
  0x26   :  { %s1124_s22 = smov 64   ;;  %s1125_s29 = smov 4  }
  0x27   :  { %75 = dma.hbm_to_vmem [thread:$0]  %s1379_s5, 1024, %s70_s18, [#allocation9], %s1124_s22, %s1124_s22, %s1125_s29  }
  0x28   :  { %s975_s19 = scalar_lea.hbm %s1374_s0, 128 }
  0x29   :  { %p976_p2 = scmp.ne.s32.totalorder %s1374_s0, %s975_s19  ;;  %p979_p3 = scmp.lt.u32.totalorder %s975_s19, %s1374_s0 }
  0x2b   :  { %p981_p4 = pnand %p979_p3, %p976_p2 }
  0x2d   :  { %984 = shalt.err (!%p981_p4)
}
  0x2e   :  { %s985_s26 = scalar_lea.vmem %s30_s20, 128  ;;  %p990_p6 = scmp.lt.s32.totalorder %s30_s20, %s30_s20 }
  0x2f   :  { %p986_p5 = scmp.ne.s32.totalorder %s30_s20, %s985_s26  ;;  %p991_p7 = scmp.lt.s32.totalorder %s985_s26, %s985_s26 }
  0x31   :  { %p992_p8 = por %p991_p7, %p990_p6 }
  0x33   :  { %p993_p9 = pnand %p992_p8, %p986_p5 }
  0x35   :  { %996 = shalt.err (!%p993_p9)
}
  0x36   :  { %35 = dma.hbm_to_vmem [thread:$0]  %s1374_s0, 128, %s30_s20, [#allocation3], %s1124_s22, %s1124_s22, %s1125_s29  }
  0x37   :  { %s1126_s27 = smov [#allocation7]   ;;  %s1127_s1 = smov [#allocation10]  }
  0x38   :  { %s55_s28 = sshll.u32 %s1126_s27, 4  ;;  %s83_s30 = sshll.u32 %s1127_s1, 4  ;;  %s56_s28 = int_to_ptr.vmem [resolvable:$true] %s55_s28  ;;  %s84_s30 = int_to_ptr.vmem [resolvable:$true] %s83_s30 }
  0x39   :  { %s997_s17 = scalar_lea.hbm %s1377_s3, 1024 }
  0x3a   :  { %p998_p10 = scmp.ne.s32.totalorder %s1377_s3, %s997_s17  ;;  %p1001_p11 = scmp.lt.u32.totalorder %s997_s17, %s1377_s3 }
  0x3c   :  { %p1003_p12 = pnand %p1001_p11, %p998_p10 }
  0x3e   :  { %1006 = shalt.err (!%p1003_p12)
}
  0x3f   :  { %s1007_s0 = scalar_lea.vmem %s56_s28, 1024  ;;  %p1012_p0 = scmp.lt.s32.totalorder %s56_s28, %s56_s28 }
  0x40   :  { %p1008_p13 = scmp.ne.s32.totalorder %s56_s28, %s1007_s0  ;;  %p1013_p1 = scmp.lt.s32.totalorder %s1007_s0, %s1007_s0 }
  0x42   :  { %p1014_p2 = por %p1013_p1, %p1012_p0 }
  0x44   :  { %p1015_p3 = pnand %p1014_p2, %p1008_p13 }
  0x46   :  { %1018 = shalt.err (!%p1015_p3)
}
  0x47   :  { %61 = dma.hbm_to_vmem [thread:$0]  %s1377_s3, 1024, %s56_s28, [#allocation6], %s1124_s22, %s1124_s22, %s1125_s29  }
  0x48   :  { %s1019_s18 = scalar_lea.hbm %s1381_s7, 1024 }
  0x49   :  { %p1020_p4 = scmp.ne.s32.totalorder %s1381_s7, %s1019_s18  ;;  %p1023_p5 = scmp.lt.u32.totalorder %s1019_s18, %s1381_s7 }
  0x4b   :  { %p1025_p6 = pnand %p1023_p5, %p1020_p4 }
  0x4d   :  { %1028 = shalt.err (!%p1025_p6)
}
  0x4e   :  { %s1029_s17 = scalar_lea.vmem %s84_s30, 1024  ;;  %p1034_p8 = scmp.lt.s32.totalorder %s84_s30, %s84_s30 }
  0x4f   :  { %p1030_p7 = scmp.ne.s32.totalorder %s84_s30, %s1029_s17  ;;  %p1035_p9 = scmp.lt.s32.totalorder %s1029_s17, %s1029_s17 }
  0x51   :  { %p1036_p10 = por %p1035_p9, %p1034_p8 }
  0x53   :  { %p1037_p11 = pnand %p1036_p10, %p1030_p7 }
  0x55   :  { %1040 = shalt.err (!%p1037_p11)
}
  0x56   :  { %89 = dma.hbm_to_vmem [thread:$0]  %s1381_s7, 1024, %s84_s30, [#allocation9], %s1124_s22, %s1124_s22, %s1125_s29  }
  0x57   :  { %s1128_s19 = smov [#allocation11]   ;;  %s1041_s0 = scalar_lea.hbm %s1383_s9, 1024 }
  0x58   :  { %s97_s21 = sshll.u32 %s1128_s19, 4  ;;  %p1042_p12 = scmp.ne.s32.totalorder %s1383_s9, %s1041_s0  ;;  %s98_s21 = int_to_ptr.vmem [resolvable:$true] %s97_s21 }
  0x59   :  { %p1045_p13 = scmp.lt.u32.totalorder %s1041_s0, %s1383_s9 }
  0x5b   :  { %p1047_p0 = pnand %p1045_p13, %p1042_p12 }
  0x5d   :  { %1050 = shalt.err (!%p1047_p0)
}
  0x5e   :  { %s1051_s18 = scalar_lea.vmem %s98_s21, 1024  ;;  %p1056_p2 = scmp.lt.s32.totalorder %s98_s21, %s98_s21 }
  0x5f   :  { %p1052_p1 = scmp.ne.s32.totalorder %s98_s21, %s1051_s18  ;;  %p1057_p3 = scmp.lt.s32.totalorder %s1051_s18, %s1051_s18 }
  0x61   :  { %p1058_p4 = por %p1057_p3, %p1056_p2 }
  0x63   :  { %p1059_p5 = pnand %p1058_p4, %p1052_p1 }
  0x65   :  { %1062 = shalt.err (!%p1059_p5)
}
  0x66   :  { %103 = dma.hbm_to_vmem [thread:$0]  %s1383_s9, 1024, %s98_s21, [#allocation12], %s1124_s22, %s1124_s22, %s1125_s29  }
  0x67   :  { %1107 = dma.done.wait [#allocation3], 128  }
  0x68   :  { %1108 = vsyncadd [#allocation3], 4294967168 }
  0x69   :  { %1109 = dma.done.wait [#allocation6], 1536  }
  0x6a   :  { %1110 = vsyncadd [#allocation6], 4294965760 }
  0x6b   :  { %1111 = dma.done.wait [#allocation9], 2048  }
  0x6c   :  { %1112 = vsyncadd [#allocation9], 4294965248 }
  0x6d   :  { %1113 = dma.done.wait [#allocation12], 1024  }
  0x6e   :  { %1114 = vsyncadd [#allocation12], 4294966272  ;;  %v1129_v0 = vmov 0   ;;  %v1130_v1 = vmov 0.0   ;;  %v892_v2 = vld [vmem:[#allocation5 + $0x4] ss:$8 sps:$4 sm:$0xff]   ;;  %v133_v21 = vlaneseq }
  0x6f   :  { %204 = vmatprep.mubr.bf16.mxu0 %v1129_v0  ;;  %797 = vmatprep.subr.bf16.mxu1 %v1130_v1  ;;  %v894_v3 = vld [vmem:[#allocation5] ss:$8 sps:$4 sm:$0xff]   ;;  %v895_v4 = vld [vmem:[#allocation5 + $0x14] ss:$8 sps:$4 sm:$0xff]   ;;  %v897_v5 = vld [vmem:[#allocation5 + $0x10] ss:$8 sps:$4 sm:$0xff]  }
  0x70   :  { %172 = vmatprep.subr.bf16.mxu0 %v892_v2  ;;  %v899_v6 = vld [vmem:[#allocation7] sm:$0xff]   ;;  %v898_v7 = vld [vmem:[#allocation2] sm:$0xff]   ;;  %v900_v8 = vld [vmem:[#allocation7 + $0x8] sm:$0xff]   ;;  %vm168_vm0 = vcmask 261120   ;;  %vm1131_vm1 = vmmov 0   ;;  %v134_v22 = vshrl.u32 %v133_v21, 7 }
  0x71   :  { %173 = vmatpush1.bf16.msra.mxu0 %v894_v3  ;;  %798 = vmatpush3.bf16.msra.mxu1 %v899_v6  ;;  %v901_v9 = vld [vmem:[#allocation7 + $0x10] sm:$0xff]   ;;  %v902_v10 = vld [vmem:[#allocation7 + $0x18] sm:$0xff]   ;;  %v903_v11 = vld [vmem:[#allocation7 + $0x20] sm:$0xff]   ;;  %s1132_s15 = smov [#allocation13]  }
  0x72   :  { %174 = vmatprep.subr.bf16.mxu0 %v895_v4  ;;  %799 = vmatprep.subr.bf16.mxu1 %v1130_v1  ;;  %v904_v12 = vld [vmem:[#allocation7 + $0x28] sm:$0xff]   ;;  %v905_v13 = vld [vmem:[#allocation7 + $0x30] sm:$0xff]   ;;  %v906_v14 = vld [vmem:[#allocation7 + $0x38] sm:$0xff]   ;;  %v135_v23 = vsub.s32 0, %v134_v22  ;;  %v139_v25 = vsub.s32 1, %v134_v22  ;;  %s688_s16 = sshll.u32 %s1132_s15, 4  ;;  %s689_s16 = int_to_ptr.vmem [resolvable:$true] %s688_s16 }
  0x73   :  { %813 = vmatprep.mubr.msk.bf16.mxu1 %vm1131_vm1, %v1130_v1  ;;  %v915_v15 = vld [vmem:[#allocation8] sm:$0xff]   ;;  %v916_v16 = vld [vmem:[#allocation8 + $0x8] sm:$0xff]   ;;  %v917_v17 = vld [vmem:[#allocation8 + $0x10] sm:$0xff]   ;;  %s1063_s17 = scalar_lea.vmem %s689_s16, 256  ;;  %p1068_p7 = scmp.lt.s32.totalorder %s689_s16, %s689_s16 }
  0x74   :  { %v918_v18 = vld [vmem:[#allocation8 + $0x18] sm:$0xff]   ;;  %v919_v19 = vld [vmem:[#allocation8 + $0x20] sm:$0xff]   ;;  %v920_v20 = vld [vmem:[#allocation8 + $0x28] sm:$0xff]   ;;  %p1064_p6 = scmp.ne.s32.totalorder %s689_s16, %s1063_s17  ;;  %p1069_p8 = scmp.lt.s32.totalorder %s1063_s17, %s1063_s17 }
  0x75   :  { %175 = vmatpush1.bf16.msra.mxu0 %v897_v5  ;;  %800 = vmatpush3.bf16.msra.mxu1 %v900_v8  ;;  %v131_v24 = vld [vmem:[%s1376_s2] sm:$0x3]  ;;  %v907_v40 = vld [vmem:[#allocation10] sm:$0xff]   ;;  %v908_v43 = vld [vmem:[#allocation10 + $0x8] sm:$0xff]  }
  0x76   :  { %817 = vmatprep.subr.bf16.mxu0 %v1130_v1  ;;  %801 = vmatprep.subr.bf16.mxu1 %v1130_v1  ;;  %v136_v26 = vrot.slane %v131_v24, %v135_v23  ;;  %v140_v27 = vrot.slane %v131_v24, %v139_v25  ;;  %v909_v44 = vld [vmem:[#allocation10 + $0x10] sm:$0xff]   ;;  %v910_v45 = vld [vmem:[#allocation10 + $0x18] sm:$0xff]   ;;  %v911_v46 = vld [vmem:[#allocation10 + $0x20] sm:$0xff]   ;;  %p1070_p9 = por %p1069_p8, %p1068_p7 }
  0x77   :  { %v912_v47 = vld [vmem:[#allocation10 + $0x28] sm:$0xff]   ;;  %v913_v48 = vld [vmem:[#allocation10 + $0x30] sm:$0xff]   ;;  %v914_v49 = vld [vmem:[#allocation10 + $0x38] sm:$0xff]  }
  0x78   :  { %724 = vmatmul.mubr.msk.bf16.vlgmr.msra.gmra.mrb[0].mxu0 %vm168_vm0, %v898_v7  ;;  %v921_v50 = vld [vmem:[#allocation8 + $0x30] sm:$0xff]   ;;  %v922_v51 = vld [vmem:[#allocation8 + $0x38] sm:$0xff]   ;;  %v923_v61 = vld [vmem:[#allocation11] sm:$0xff]   ;;  %p1071_p10 = pnand %p1070_p9, %p1064_p6 }
  0x79   :  { %802 = vmatpush3.bf16.msra.mxu1 %v901_v9  ;;  %833 = vmatprep.mubr.msk.bf16.mxu0 %vm1131_vm1, %v1130_v1  ;;  %v725_v52 = vld [vmem:[%s1378_s4] ss:$0 sm:$0xff]  ;;  %v924_v63 = vld [vmem:[#allocation11 + $0x8] sm:$0xff]   ;;  %v925_v0 = vld [vmem:[#allocation11 + $0x10] sm:$0xff]  }
  0x7a   :  { %803 = vmatprep.subr.bf16.mxu1 %v1130_v1  ;;  %818 = vmatpush3.bf16.msra.mxu0 %v915_v15  ;;  %v926_v2 = vld [vmem:[#allocation11 + $0x18] sm:$0xff]   ;;  %v927_v3 = vld [vmem:[#allocation11 + $0x20] sm:$0xff]   ;;  %v928_v4 = vld [vmem:[#allocation11 + $0x28] sm:$0xff]  }
  0x7b   :  { %819 = vmatprep.subr.bf16.mxu0 %v1130_v1  ;;  %v743_v5 = vld [vmem:[%s1382_s8] ss:$0 sm:$0xff]  ;;  %v929_v6 = vld [vmem:[#allocation11 + $0x30] sm:$0xff]  }
  0x7d   :  { %804 = vmatpush3.bf16.msra.mxu1 %v902_v10 }
  0x7e   :  { %805 = vmatprep.subr.bf16.mxu1 %v1130_v1  ;;  %820 = vmatpush3.bf16.msra.mxu0 %v916_v16 }
  0x7f   :  { %821 = vmatprep.subr.bf16.mxu0 %v1130_v1 }
  0x81   :  { %806 = vmatpush3.bf16.msra.mxu1 %v903_v11  ;;  %v930_v11 = vld [vmem:[#allocation11 + $0x38] sm:$0xff]  }
  0x82   :  { %807 = vmatprep.subr.bf16.mxu1 %v1130_v1  ;;  %822 = vmatpush3.bf16.msra.mxu0 %v917_v17  ;;  %v734_v17 = vld [vmem:[%s1380_s6] ss:$0 sm:$0xff] }
  0x83   :  { %823 = vmatprep.subr.bf16.mxu0 %v1130_v1 }
  0x85   :  { %808 = vmatpush3.bf16.msra.mxu1 %v904_v12 }
  0x86   :  { %809 = vmatprep.subr.bf16.mxu1 %v1130_v1  ;;  %824 = vmatpush3.bf16.msra.mxu0 %v918_v18 }
  0x87   :  { %825 = vmatprep.subr.bf16.mxu0 %v1130_v1 }
  0x89   :  { %810 = vmatpush3.bf16.msra.mxu1 %v905_v13 }
  0x8a   :  { %811 = vmatprep.subr.bf16.mxu1 %v1130_v1  ;;  %826 = vmatpush3.bf16.msra.mxu0 %v919_v19 }
  0x8b   :  { %827 = vmatprep.subr.bf16.mxu0 %v1130_v1 }
  0x8d   :  { %812 = vmatpush3.bf16.msra.mxu1 %v906_v14 }
  0x8e   :  { %837 = vmatprep.subr.bf16.mxu1 %v1130_v1  ;;  %828 = vmatpush3.bf16.msra.mxu0 %v920_v20 }
  0x8f   :  { %829 = vmatprep.subr.bf16.mxu0 %v1130_v1 }
  0x92   :  { %830 = vmatpush3.bf16.msra.mxu0 %v921_v50 }
  0x93   :  { %831 = vmatprep.subr.bf16.mxu0 %v1130_v1 }
  0x96   :  { %832 = vmatpush3.bf16.msra.mxu0 %v922_v51 }
  0x97   :  { %857 = vmatprep.subr.bf16.mxu0 %v1130_v1 }
 0x14b   :  { %v206_v28 = vpop.f32.mrb[0].mxu0 }
 0x14c   :  { %v207_v29 = vadd.f32 %v206_v28, %v136_v26  ;;  %v208_v30 = vpop.f32.mrb[1].mxu0 }
 0x14d   :  { %v209_v31 = vadd.f32 %v208_v30, %v140_v27  ;;  %v210_v32 = vpop.f32.mrb[2].mxu0 }
 0x14e   :  { %v211_v33 = vadd.f32 %v210_v32, %v136_v26  ;;  %v212_v34 = vpop.f32.mrb[3].mxu0  ;;  %v215_v36 = vmax.f32 %v207_v29, 0.0 }
 0x14f   :  { %v213_v35 = vadd.f32 %v212_v34, %v140_v27  ;;  %v216_v38 = vmax.f32 %v209_v31, 0.0 }
 0x150   :  { %v217_v37 = vmax.f32 %v211_v33, 0.0 }
 0x151   :  { %v218_v39 = vmax.f32 %v213_v35, 0.0 }
 0x152   :  { %v236_v41 = vpack.c.bf16 %v217_v37, %v215_v36 }
 0x153   :  { %v468_v42 = vpack.c.bf16 %v218_v39, %v216_v38 }
 0x154   :  { %814 = vmatmul.mubr.bf16.vlgmr.msra.gmra.mrb[0].mxu1 %v236_v41 }
 0x155   :  { %838 = vmatpush3.bf16.msra.mxu1 %v907_v40  ;;  %853 = vmatprep.mubr.msk.bf16.mxu1 %vm1131_vm1, %v1130_v1 }
 0x156   :  { %839 = vmatprep.subr.bf16.mxu1 %v1130_v1 }
 0x159   :  { %840 = vmatpush3.bf16.msra.mxu1 %v908_v43 }
 0x15a   :  { %841 = vmatprep.subr.bf16.mxu1 %v1130_v1 }
 0x15d   :  { %842 = vmatpush3.bf16.msra.mxu1 %v909_v44 }
 0x15e   :  { %843 = vmatprep.subr.bf16.mxu1 %v1130_v1 }
 0x161   :  { %844 = vmatpush3.bf16.msra.mxu1 %v910_v45 }
 0x162   :  { %845 = vmatprep.subr.bf16.mxu1 %v1130_v1 }
 0x165   :  { %846 = vmatpush3.bf16.msra.mxu1 %v911_v46 }
 0x166   :  { %847 = vmatprep.subr.bf16.mxu1 %v1130_v1 }
 0x169   :  { %848 = vmatpush3.bf16.msra.mxu1 %v912_v47 }
 0x16a   :  { %849 = vmatprep.subr.bf16.mxu1 %v1130_v1 }
 0x16d   :  { %850 = vmatpush3.bf16.msra.mxu1 %v913_v48 }
 0x16e   :  { %851 = vmatprep.subr.bf16.mxu1 %v1130_v1 }
 0x171   :  { %852 = vmatpush3.bf16.msra.mxu1 %v914_v49 }
 0x174   :  { %854 = vmatmul.mubr.bf16.vlgmr.msra.gmra.mrb[4].mxu1 %v468_v42 }
 0x227   :  { %v325_v53 = vpop.f32.mrb[0].mxu1 }
 0x228   :  { %v326_v54 = vadd.f32 %v725_v52, %v325_v53  ;;  %v815_v55 = vpop.f32.mrb[1].mxu1 }
 0x229   :  { %v328_v56 = vpop.f32.mrb[2].mxu1 }
 0x22a   :  { %v329_v57 = vadd.f32 %v725_v52, %v328_v56  ;;  %v816_v58 = vpop.f32.mrb[3].mxu1  ;;  %v332_v59 = vmax.f32 %v326_v54, 0.0 }
 0x22c   :  { %v333_v60 = vmax.f32 %v329_v57, 0.0 }
 0x22e   :  { %v351_v62 = vpack.c.bf16 %v333_v60, %v332_v59 }
 0x230   :  { %834 = vmatmul.mubr.bf16.vlgmr.msra.gmra.mrb[4].mxu0 %v351_v62 }
 0x231   :  { %858 = vmatpush3.bf16.msra.mxu0 %v923_v61  ;;  %873 = vmatprep.mubr.msk.bf16.mxu0 %vm1131_vm1, %v1130_v1 }
 0x232   :  { %859 = vmatprep.subr.bf16.mxu0 %v1130_v1 }
 0x235   :  { %860 = vmatpush3.bf16.msra.mxu0 %v924_v63 }
 0x236   :  { %861 = vmatprep.subr.bf16.mxu0 %v1130_v1 }
 0x239   :  { %862 = vmatpush3.bf16.msra.mxu0 %v925_v0 }
 0x23a   :  { %863 = vmatprep.subr.bf16.mxu0 %v1130_v1 }
 0x23d   :  { %864 = vmatpush3.bf16.msra.mxu0 %v926_v2 }
 0x23e   :  { %865 = vmatprep.subr.bf16.mxu0 %v1130_v1 }
 0x241   :  { %866 = vmatpush3.bf16.msra.mxu0 %v927_v3 }
 0x242   :  { %867 = vmatprep.subr.bf16.mxu0 %v1130_v1 }
 0x245   :  { %868 = vmatpush3.bf16.msra.mxu0 %v928_v4 }
 0x246   :  { %869 = vmatprep.subr.bf16.mxu0 %v1130_v1 }
 0x247   :  { %v557_v7 = vpop.f32.mrb[4].mxu1 }
 0x248   :  { %v558_v8 = vadd.f32 %v743_v5, %v557_v7  ;;  %v855_v9 = vpop.f32.mrb[5].mxu1 }
 0x249   :  { %v560_v10 = vpop.f32.mrb[6].mxu1  ;;  %870 = vmatpush3.bf16.msra.mxu0 %v929_v6 }
 0x24a   :  { %v561_v12 = vadd.f32 %v743_v5, %v560_v10  ;;  %v856_v13 = vpop.f32.mrb[7].mxu1  ;;  %871 = vmatprep.subr.bf16.mxu0 %v1130_v1  ;;  %v564_v14 = vmax.f32 %v558_v8, 0.0 }
 0x24c   :  { %v565_v15 = vmax.f32 %v561_v12, 0.0 }
 0x24d   :  { %872 = vmatpush3.bf16.msra.mxu0 %v930_v11 }
 0x24e   :  { %v583_v16 = vpack.c.bf16 %v565_v15, %v564_v14 }
 0x250   :  { %874 = vmatmul.mubr.bf16.vlgmr.msra.gmra.mrb[8].mxu0 %v583_v16 }
 0x303   :  { %v440_v18 = vpop.f32.mrb[4].mxu0 }
 0x304   :  { %v441_v19 = vadd.f32 %v734_v17, %v440_v18  ;;  %v835_v20 = vpop.f32.mrb[5].mxu0 }
 0x305   :  { %v443_v21 = vpop.f32.mrb[6].mxu0 }
 0x306   :  { %v447_v22 = vmax.f32 %v441_v19, 0.0  ;;  %v444_v23 = vadd.f32 %v734_v17, %v443_v21  ;;  %v836_v24 = vpop.f32.mrb[7].mxu0 }
 0x308   :  { %449 = vst [vmem:[#allocation13] sm:$0xff] %v447_v22  ;;  %v448_v1 = vmax.f32 %v444_v23, 0.0 }
 0x30a   :  { %450 = vst [vmem:[#allocation13 + $0x8] sm:$0xff] %v448_v1 }
 0x30b   :  { %1074 = shalt.err (!%p1071_p10)
}
 0x30c   :  { %s1075_s28 = scalar_lea.hbm %s1385_s11, 256 }
 0x30d   :  { %p1076_p11 = scmp.ne.s32.totalorder %s1385_s11, %s1075_s28  ;;  %p1079_p12 = scmp.lt.u32.totalorder %s1075_s28, %s1385_s11 }
 0x30f   :  { %p1081_p13 = pnand %p1079_p12, %p1076_p11 }
 0x311   :  { %1084 = shalt.err (!%p1081_p13)
}
 0x312   :  { %694 = dma.vmem_to_hbm [thread:$0]  %s689_s16, 256, %s1385_s11, [#allocation4], %s1120_s13, %s1120_s13, %s1121_s14  }
 0x313   :  { %v752_v25 = vld [vmem:[%s1384_s10] ss:$0 sm:$0xff]  ;;  %s1133_s5 = smov [#allocation14]  }
 0x314   :  { %s700_s18 = sshll.u32 %s1133_s5, 4  ;;  %s701_s18 = int_to_ptr.vmem [resolvable:$true] %s700_s18 }
 0x315   :  { %s1085_s7 = scalar_lea.vmem %s701_s18, 256  ;;  %p1090_p1 = scmp.lt.s32.totalorder %s701_s18, %s701_s18 }
 0x316   :  { %p1086_p0 = scmp.ne.s32.totalorder %s701_s18, %s1085_s7  ;;  %p1091_p2 = scmp.lt.s32.totalorder %s1085_s7, %s1085_s7 }
 0x318   :  { %p1092_p3 = por %p1091_p2, %p1090_p1 }
 0x31a   :  { %p1093_p4 = pnand %p1092_p3, %p1086_p0 }
 0x323   :  { %v672_v26 = vpop.f32.mrb[8].mxu0 }
 0x324   :  { %v673_v27 = vadd.f32 %v752_v25, %v672_v26  ;;  %v875_v28 = vpop.f32.mrb[9].mxu0 }
 0x325   :  { %v675_v29 = vpop.f32.mrb[10].mxu0 }
 0x326   :  { %v679_v30 = vmax.f32 %v673_v27, 0.0  ;;  %v676_v31 = vadd.f32 %v752_v25, %v675_v29  ;;  %v876_v32 = vpop.f32.mrb[11].mxu0 }
 0x328   :  { %681 = vst [vmem:[#allocation14] sm:$0xff] %v679_v30  ;;  %v680_v33 = vmax.f32 %v676_v31, 0.0 }
 0x32a   :  { %682 = vst [vmem:[#allocation14 + $0x8] sm:$0xff] %v680_v33 }
 0x32b   :  { %1096 = shalt.err (!%p1093_p4)
}
 0x32c   :  { %s1097_s30 = scalar_lea.hbm %s1386_s12, 256 }
 0x32d   :  { %p1098_p5 = scmp.ne.s32.totalorder %s1386_s12, %s1097_s30  ;;  %p1101_p6 = scmp.lt.u32.totalorder %s1097_s30, %s1386_s12 }
 0x32f   :  { %p1103_p7 = pnand %p1101_p6, %p1098_p5 }
 0x331   :  { %1106 = shalt.err (!%p1103_p7)
}
 0x332   :  { %706 = dma.vmem_to_hbm [thread:$0]  %s701_s18, 256, %s1386_s12, [#allocation15], %s1120_s13, %s1120_s13, %s1121_s14  }
 0x333   :  { %1115 = dma.done.wait [#allocation4], 256  }
 0x334   :  { %1116 = vsyncadd [#allocation4], 4294967040 }
 0x335   :  { %1117 = dma.done.wait [#allocation15], 256  }
 0x336   :  { %1118 = vsyncadd [#allocation15], 4294967040 }
 0x337   :  { %713 = vsyncpa [#allocation3], 1 }
 0x338   :  { %714 = vsyncpa [#allocation6], 1 }
 0x339   :  { %715 = vsyncpa [#allocation9], 1 }
 0x33a   :  { %716 = vsyncpa [#allocation12], 1 }
 0x33b   :  { %717 = vsyncpa [#allocation4], 1 }
 0x33c   :  { %718 = vsyncpa [#allocation15], 1 }

</bundles_post_ra>
